<compile_context>
chip_gen: v7x
topology: tpu7x:2x2x1
jax: 0.10.0
libtpu: 0.0.40
codegen_flags: <defaults>
</compile_context>

<pallas_src>
import jax
import jax.numpy as jnp
from jax.experimental import pallas as pl
from jax.experimental.pallas import tpu as pltpu

_MIB = 1024 * 1024


def _round_up(v, m):
    return ((v + m - 1) // m) * m


def _pad_to(a, shape):
    pads = [(0, t - s) for s, t in zip(a.shape, shape)]
    return jnp.pad(a, pads)


# ----------------------------- Pallas kernel -------------------------------
def gcn_kernel(a_ref, drow_ref, delta_ref, dcol_ref, x_ref, wt_ref, o_ref,
               hs_ref):
    # a_ref    : (1, TM, TK)    int8 raw 0/1 adjacency tile
    # drow_ref : (1, TM, 1)     f32 row scale (D^-1/2 or D^-1)
    # delta_ref: (1, TM, 1)     f32 diagonal fix-up (A_mod = A + diag(delta))
    # dcol_ref : (1, TK, 1)     f32 col scale k-tile (D^-1/2 or ones)
    # x_ref    : (1, TK, Di)    bf16 node-feature k-tile
    # wt_ref   : (Di, Do)       bf16 weights (stored transposed)
    # o_ref    : (1, TM, Do)    f32 output tile (resident across k -> accumulator)
    # hs_ref   : (Np, Do)       bf16 scratch: dcol * leaky_relu(x @ W_t)
    i = pl.program_id(1)
    k = pl.program_id(2)
    nk = pl.num_programs(2)
    tm = a_ref.shape[1]
    tk = a_ref.shape[2]
    off_k = pl.multiple_of(k * tk, tk)

    # ---- i == 0 sweep: fill this batch element's Hs one k-tile at a time ---
    @pl.when(i == 0)
    def _():
        h = jnp.dot(x_ref[0], wt_ref[...],
                    preferred_element_type=jnp.float32)        # (TK, Do) f32
        h = jnp.where(h > 0, h, 0.01 * h)                       # LeakyReLU(0.01)
        # Keep dcol AFTER the activation (folding through leaky_relu would need
        # the dcol >= 0 invariant; don't rely on it).
        hs_ref[pl.ds(off_k, tk), :] = (dcol_ref[0] * h).astype(hs_ref.dtype)

    # ---- accumulate A_tile @ Hs_k directly into the resident output block --
    # int8 -> f32 -> bf16 (both converts natively supported; 0/1 values exact).
    a = a_ref[0].astype(jnp.float32).astype(jnp.bfloat16)
    contrib = jnp.dot(a, hs_ref[pl.ds(off_k, tk), :],
                      preferred_element_type=jnp.float32)

    @pl.when(k == 0)
    def _():
        o_ref[0] = contrib

    @pl.when(k > 0)
    def _():
        o_ref[0] += contrib

    # ---- finalize: diagonal fix-up term + row scale ------------------------
    @pl.when(k == nk - 1)
    def _():
        off_i = pl.multiple_of(i * tm, tm)
        hs_i = hs_ref[pl.ds(off_i, tm), :].astype(jnp.float32)  # (TM, Do)
        out = drow_ref[0] * (o_ref[0] + delta_ref[0] * hs_i)
        o_ref[0] = out.astype(o_ref.dtype)


# --------------------------- VMEM budget / tiling ---------------------------
def _vmem_capacity_bytes():
    try:
        cap = int(pltpu.get_tpu_info().vmem_capacity_bytes)
        if cap > 0:
            return cap
    except Exception:
        pass
    return 64 * _MIB          # conservative (v7x-sized) fallback


def _vmem_bytes_estimate(N_pad, Din_pad, Dout_pad, tm, tk):
    a_tiles = 2 * tm * tk * 1                 # int8 A tile, double buffered
    conv_tmp = tm * tk * 6                    # i8->f32->bf16 conversion temporaries
    x_tiles = 2 * tk * Din_pad * 2            # bf16 x k-tile, double buffered
    w_full = 2 * Din_pad * Dout_pad * 2       # bf16 W (constant block, dbl-buffered)
    out_tiles = 2 * tm * Dout_pad * 4         # f32 resident output block
    vecs = 2 * (2 * tm + tk) * 128 * 4        # drow/delta/dcol lane-padded to 128
    hs = N_pad * Dout_pad * 2                 # resident Hs scratch
    return a_tiles + conv_tmp + x_tiles + w_full + out_tiles + vecs + hs


def _choose_tiles(N_pad, Din_pad, Dout_pad, budget):
    tm = 256 if N_pad % 256 == 0 else 128
    # Largest k-tile (multiple of 128 dividing N_pad) that fits the VMEM budget:
    # big k-tiles amortize per-grid-step overhead and make A DMAs large.
    candidates = [t for t in range(128, N_pad + 1, 128) if N_pad % t == 0]
    for tk in sorted(candidates, reverse=True):
        if _vmem_bytes_estimate(N_pad, Din_pad, Dout_pad, tm, tk) <= budget:
            return tm, tk
    # TODO(synk): if even tk=128 blows the budget (huge N*Dout on v7x's 64 MiB),
    # fall back to a two-pass design: one pallas_call writes Hs (bf16) to HBM,
    # a second streams Hs k-tiles alongside A tiles instead of resident Hs.
    return tm, 128


# ------------------------------- pallas_call ---------------------------------
def gcn_pallas(A, drow, delta, dcol, x, w_t, *, tm, tk, vmem_limit):
    B, N_pad, _ = A.shape
    Din_pad, Dout_pad = w_t.shape
    nm = N_pad // tm
    nk = N_pad // tk

    flops = 2 * B * (N_pad * N_pad * Dout_pad + N_pad * Din_pad * Dout_pad)
    bytes_accessed = (A.size * 1                      # int8 adjacency
                      + x.size * 2 + w_t.size * 2     # bf16 features / weights
                      + 3 * B * N_pad * 4             # drow/delta/dcol
                      + B * N_pad * Dout_pad * 4)     # f32 output writeback
    cost = pl.CostEstimate(flops=flops, transcendentals=0,
                           bytes_accessed=bytes_accessed)

    return pl.pallas_call(
        gcn_kernel,
        out_shape=jax.ShapeDtypeStruct((B, N_pad, Dout_pad), jnp.float32),
        grid_spec=pltpu.PrefetchScalarGridSpec(
            num_scalar_prefetch=0,
            grid=(B, nm, nk),
            in_specs=[
                pl.BlockSpec((1, tm, tk), lambda b, i, k: (b, i, k)),       # A (i8)
                pl.BlockSpec((1, tm, 1), lambda b, i, k: (b, i, 0)),        # drow
                pl.BlockSpec((1, tm, 1), lambda b, i, k: (b, i, 0)),        # delta
                pl.BlockSpec((1, tk, 1), lambda b, i, k: (b, k, 0)),        # dcol
                pl.BlockSpec((1, tk, Din_pad), lambda b, i, k: (b, k, 0)),  # x
                # W's block index never changes; kept on the default (proven)
                # pipelined path at the cost of one redundant Din*Dout bf16 buffer.
                pl.BlockSpec((Din_pad, Dout_pad), lambda b, i, k: (0, 0)),  # W_t
            ],
            out_specs=pl.BlockSpec((1, tm, Dout_pad), lambda b, i, k: (b, i, 0)),
            scratch_shapes=[
                pltpu.VMEM((N_pad, Dout_pad), jnp.bfloat16),  # resident Hs
            ],
        ),
        compiler_params=pltpu.CompilerParams(
            dimension_semantics=("parallel", "arbitrary", "arbitrary"),
            vmem_limit_bytes=vmem_limit,
        ),
        cost_estimate=cost,
    )(A, drow, delta, dcol, x, w_t)


# ---------------- plain-JAX glue: normalization *vectors* only --------------
def adj_normalize_vectors(A):
    """Cheap reductions over A only.  Never materializes A_mod: returns
    (drow, delta, dcol) so the kernel can apply
        A_norm @ h  ==  drow * ( A @ (dcol*h) + delta * (dcol*h) ).
    """
    row_sum = A.sum(-1)                                   # (B, N)
    col_sum = A.sum(-2)                                   # (B, N)
    diag_old = jnp.diagonal(A, axis1=1, axis2=2)          # (B, N)
    mask = (row_sum + col_sum) != 0
    diag_new = jnp.where(mask, 1.0, diag_old)
    delta = diag_new - diag_old                           # diagonal fix-up
    d = row_sum + delta                                   # degrees of A_mod
    # Diagonal changes never break/create symmetry -> check raw A directly.
    symmetric = jnp.all(A == jnp.swapaxes(A, 1, 2))
    d_sym = jnp.where(d != 0, d ** -0.5, d)               # D^{-1/2}
    d_asym = jnp.where(d != 0, 1.0 / d, d)                # D^{-1}
    drow = jnp.where(symmetric, d_sym, d_asym)            # (B, N)
    dcol = jnp.where(symmetric, d_sym, jnp.ones_like(d))  # (B, N)
    return drow, delta, dcol


def graph_convolution_forward(x, A, w_t):
    B, N, D_in = x.shape
    Din_w, D_out = w_t.shape
    assert Din_w == D_in

    drow, delta, dcol = adj_normalize_vectors(A)

    # Pad everything to lane-dense / MXU-friendly multiples of 128.
    N_pad = _round_up(N, 128)
    Din_pad = _round_up(D_in, 128)
    Dout_pad = _round_up(D_out, 128)

    # Per-generation VMEM budget: ~56 MiB on v7x (64 MiB parts), ~100 MiB on
    # v5e/v6e (128 MiB parts).  Tile sizes are derived from 75% of the limit,
    # leaving slack for conversion temporaries / compiler scratch.
    cap = _vmem_capacity_bytes()
    vmem_limit = int(min(cap - 8 * _MIB, 100 * _MIB))
    tm, tk = _choose_tiles(N_pad, Din_pad, Dout_pad, budget=int(0.75 * vmem_limit))

    # A is a {0,1} adjacency in BiGCN -> int8 HBM storage is exact and halves the
    # dominant A-read traffic.  For weighted graphs, switch this to bf16.
    A_p = _pad_to(A, (B, N_pad, N_pad)).astype(jnp.int8)
    x_p = _pad_to(x, (B, N_pad, Din_pad)).astype(jnp.bfloat16)
    w_p = _pad_to(w_t, (Din_pad, Dout_pad)).astype(jnp.bfloat16)
    drow_p = _pad_to(drow, (B, N_pad))[..., None].astype(jnp.float32)
    delta_p = _pad_to(delta, (B, N_pad))[..., None].astype(jnp.float32)
    dcol_p = _pad_to(dcol, (B, N_pad))[..., None].astype(jnp.float32)

    out = gcn_pallas(A_p, drow_p, delta_p, dcol_p, x_p, w_p,
                     tm=tm, tk=tk, vmem_limit=vmem_limit)
    # NOTE: output kept f32 to match the fp32 module; cast to bf16 here if the
    # consumer tolerates it (halves writeback traffic).
    return out[:, :N, :D_out]


# ----------------------------------- main -----------------------------------
if __name__ == "__main__":
    B, N, D_in, D_out = 2, 16, 32, 32

    key = jax.random.PRNGKey(0)
    k_x, k_a, k_w = jax.random.split(key, 3)

    x = jax.random.normal(k_x, (B, N, D_in), dtype=jnp.float32)
    # random 0/1 adjacency (generally asymmetric -> exercises D^{-1} A path)
    A = (jax.random.uniform(k_a, (B, N, N)) < 0.3).astype(jnp.float32)

    # nn.Linear(input_dim, output_dim, bias=False): weight (D_out, D_in),
    # stored transposed as (D_in, D_out).
    bound = 1.0 / (D_in ** 0.5)
    w = jax.random.uniform(k_w, (D_out, D_in), minval=-bound, maxval=bound,
                           dtype=jnp.float32)
    w_t = w.T

    fwd = jax.jit(graph_convolution_forward)
    out = jax.block_until_ready(fwd(x, A, w_t))

    # pure-fp32 JAX reference replicating the PyTorch module exactly
    def reference(x, A, w_t):
        Bb, Nn, _ = A.shape
        At = jnp.swapaxes(A, 1, 2)
        mask = jnp.sum(A + At, axis=-1) != 0
        diag_old = jnp.diagonal(A, axis1=1, axis2=2)
        diag_new = jnp.where(mask, 1.0, diag_old)
        eye = jnp.eye(Nn, dtype=A.dtype)
        A_mod = A * (1.0 - eye) + diag_new[:, :, None] * eye
        d = A_mod.sum(-1)
        symmetric = jnp.all(A_mod == jnp.swapaxes(A_mod, 1, 2))
        d_sym = jnp.where(d != 0, d ** -0.5, d)
        d_asym = jnp.where(d != 0, 1.0 / d, d)
        drow = jnp.where(symmetric, d_sym, d_asym)[:, :, None]
        dcol = jnp.where(symmetric, d_sym, jnp.ones_like(d))[:, None, :]
        h = x @ w_t
        h = jnp.where(h > 0, h, 0.01 * h)
        return (drow * A_mod * dcol) @ h

    ref = reference(x, A, w_t)
    assert out.shape == (B, N, D_out)
    max_err = float(jnp.max(jnp.abs(out - ref)))
    assert jnp.allclose(out, ref, atol=5e-2, rtol=5e-2), f"mismatch: {max_err}"

    print("KERNEL_OK")
</pallas_src>

<mosaic_0001>
module attributes {stable_mosaic.version = 11 : i64} {
  func.func @gcn_kernel(%arg0: i32, %arg1: i32, %arg2: i32, %arg3: memref<1x128x128xi8, #tpu.memory_space<vmem>>, %arg4: memref<1x128x1xf32, #tpu.memory_space<vmem>>, %arg5: memref<1x128x1xf32, #tpu.memory_space<vmem>>, %arg6: memref<1x128x1xf32, #tpu.memory_space<vmem>>, %arg7: memref<1x128x128xbf16, #tpu.memory_space<vmem>>, %arg8: memref<128x128xbf16, #tpu.memory_space<vmem>>, %arg9: memref<1x128x128xf32, #tpu.memory_space<vmem>>, %arg10: memref<128x128xbf16, #tpu.memory_space<vmem>>) attributes {dimension_semantics = [#tpu.dimension_semantics<parallel>, #tpu.dimension_semantics<arbitrary>, #tpu.dimension_semantics<arbitrary>], iteration_bounds = array<i64: 2, 1, 1>, scalar_prefetch = 0 : i64, scratch_operands = 1 : i64, tpu.core_type = #tpu.core_type<tc>, window_params = [{transform_indices = @transform_0, window_bounds = array<i64: 1, 128, 128>}, {transform_indices = @transform_1, window_bounds = array<i64: 1, 128, 1>}, {transform_indices = @transform_2, window_bounds = array<i64: 1, 128, 1>}, {transform_indices = @transform_3, window_bounds = array<i64: 1, 128, 1>}, {transform_indices = @transform_4, window_bounds = array<i64: 1, 128, 128>}, {pipeline_mode = #tpu.pipeline_mode<synchronous>, transform_indices = @transform_5, window_bounds = array<i64: 128, 128>}, {transform_indices = @transform_6, window_bounds = array<i64: 1, 128, 128>}]} {
    %c128_i32 = arith.constant 128 : i32
    %0 = arith.muli %arg2, %c128_i32 : i32
    %1 = tpu.assume_multiple %0, 128 : i32
    %c0_i32 = arith.constant 0 : i32
    %2 = arith.cmpi eq, %arg1, %c0_i32 : i32
    %3 = arith.extui %2 : i1 to i32
    %c0_i32_0 = arith.constant 0 : i32
    %4 = arith.cmpi ne, %3, %c0_i32_0 : i32
    scf.if %4 {
      %c0_10 = arith.constant 0 : index
      %c0_11 = arith.constant 0 : index
      %c0_12 = arith.constant 0 : index
      %21 = vector.load %arg7[%c0_10, %c0_11, %c0_12] : memref<1x128x128xbf16, #tpu.memory_space<vmem>>, vector<1x128x128xbf16>
      %22 = vector.shape_cast %21 : vector<1x128x128xbf16> to vector<128x128xbf16>
      %c0_13 = arith.constant 0 : index
      %c0_14 = arith.constant 0 : index
      %23 = vector.load %arg8[%c0_13, %c0_14] : memref<128x128xbf16, #tpu.memory_space<vmem>>, vector<128x128xbf16>
      %cst_15 = arith.constant dense<0.000000e+00> : vector<128x128xf32>
      %24 = tpu.matmul %22, %23, %cst_15 {dimension_numbers = #tpu.dot_dimension_numbers<[1], [0], [0], [1], [0, 0, 1, 1], [], []>} : vector<128x128xbf16>, vector<128x128xbf16>, vector<128x128xf32> -> vector<128x128xf32>
      %cst_16 = arith.constant 0.000000e+00 : f32
      %25 = vector.broadcast %cst_16 : f32 to vector<128x128xf32>
      %26 = arith.cmpf ogt, %24, %25 : vector<128x128xf32>
      %cst_17 = arith.constant 0.00999999977 : f32
      %27 = vector.broadcast %cst_17 : f32 to vector<128x128xf32>
      %28 = arith.mulf %27, %24 : vector<128x128xf32>
      %29 = arith.select %26, %24, %28 : vector<128x128xi1>, vector<128x128xf32>
      %c0_18 = arith.constant 0 : index
      %c0_19 = arith.constant 0 : index
      %c0_20 = arith.constant 0 : index
      %30 = vector.load %arg6[%c0_18, %c0_19, %c0_20] : memref<1x128x1xf32, #tpu.memory_space<vmem>>, vector<1x128x1xf32>
      %31 = vector.shape_cast %30 : vector<1x128x1xf32> to vector<128x1xf32>
      %32 = vector.broadcast %31 : vector<128x1xf32> to vector<128x128xf32>
      %33 = arith.mulf %32, %29 : vector<128x128xf32>
      %34 = arith.truncf %33 : vector<128x128xf32> to vector<128x128xbf16>
      %35 = arith.index_cast %1 : i32 to index
      %c0_21 = arith.constant 0 : index
      %36 = vector.load %arg10[%35, %c0_21] : memref<128x128xbf16, #tpu.memory_space<vmem>>, vector<128x128xbf16>
      tpu.vector_store %arg10[%35, %c0_21], %34 {strides = array<i32>} : memref<128x128xbf16, #tpu.memory_space<vmem>>, vector<128x128xbf16>,
    } else {
    }
    %c0 = arith.constant 0 : index
    %c0_1 = arith.constant 0 : index
    %c0_2 = arith.constant 0 : index
    %5 = vector.load %arg3[%c0, %c0_1, %c0_2] : memref<1x128x128xi8, #tpu.memory_space<vmem>>, vector<1x128x128xi8>
    %6 = vector.shape_cast %5 : vector<1x128x128xi8> to vector<128x128xi8>
    %7 = arith.sitofp %6 : vector<128x128xi8> to vector<128x128xf32>
    %8 = arith.truncf %7 : vector<128x128xf32> to vector<128x128xbf16>
    %9 = arith.index_cast %1 : i32 to index
    %c0_3 = arith.constant 0 : index
    %10 = vector.load %arg10[%9, %c0_3] : memref<128x128xbf16, #tpu.memory_space<vmem>>, vector<128x128xbf16>
    %cst = arith.constant dense<0.000000e+00> : vector<128x128xf32>
    %11 = tpu.matmul %8, %10, %cst {dimension_numbers = #tpu.dot_dimension_numbers<[1], [0], [0], [1], [0, 0, 1, 1], [], []>} : vector<128x128xbf16>, vector<128x128xbf16>, vector<128x128xf32> -> vector<128x128xf32>
    %c0_i32_4 = arith.constant 0 : i32
    %12 = arith.cmpi eq, %arg2, %c0_i32_4 : i32
    %13 = arith.extui %12 : i1 to i32
    %c0_i32_5 = arith.constant 0 : i32
    %14 = arith.cmpi ne, %13, %c0_i32_5 : i32
    scf.if %14 {
      %c0_10 = arith.constant 0 : index
      %c0_11 = arith.constant 0 : index
      %c0_12 = arith.constant 0 : index
      %21 = vector.load %arg9[%c0_10, %c0_11, %c0_12] : memref<1x128x128xf32, #tpu.memory_space<vmem>>, vector<1x128x128xf32>
      %22 = vector.shape_cast %21 : vector<1x128x128xf32> to vector<128x128xf32>
      %23 = vector.shape_cast %11 : vector<128x128xf32> to vector<1x128x128xf32>
      tpu.vector_store %arg9[%c0_10, %c0_11, %c0_12], %23 {strides = array<i32>} : memref<1x128x128xf32, #tpu.memory_space<vmem>>, vector<1x128x128xf32>,
    } else {
    }
    %c0_i32_6 = arith.constant 0 : i32
    %15 = arith.cmpi sgt, %arg2, %c0_i32_6 : i32
    %16 = arith.extui %15 : i1 to i32
    %c0_i32_7 = arith.constant 0 : i32
    %17 = arith.cmpi ne, %16, %c0_i32_7 : i32
    scf.if %17 {
      %c0_10 = arith.constant 0 : index
      %c0_11 = arith.constant 0 : index
      %c0_12 = arith.constant 0 : index
      %21 = vector.load %arg9[%c0_10, %c0_11, %c0_12] : memref<1x128x128xf32, #tpu.memory_space<vmem>>, vector<1x128x128xf32>
      %22 = vector.shape_cast %21 : vector<1x128x128xf32> to vector<128x128xf32>
      %23 = arith.addf %22, %11 : vector<128x128xf32>
      %c0_13 = arith.constant 0 : index
      %c0_14 = arith.constant 0 : index
      %c0_15 = arith.constant 0 : index
      %24 = vector.load %arg9[%c0_13, %c0_14, %c0_15] : memref<1x128x128xf32, #tpu.memory_space<vmem>>, vector<1x128x128xf32>
      %25 = vector.shape_cast %24 : vector<1x128x128xf32> to vector<128x128xf32>
      %26 = vector.shape_cast %23 : vector<128x128xf32> to vector<1x128x128xf32>
      tpu.vector_store %arg9[%c0_13, %c0_14, %c0_15], %26 {strides = array<i32>} : memref<1x128x128xf32, #tpu.memory_space<vmem>>, vector<1x128x128xf32>,
    } else {
    }
    %c0_i32_8 = arith.constant 0 : i32
    %18 = arith.cmpi eq, %arg2, %c0_i32_8 : i32
    %19 = arith.extui %18 : i1 to i32
    %c0_i32_9 = arith.constant 0 : i32
    %20 = arith.cmpi ne, %19, %c0_i32_9 : i32
    scf.if %20 {
      %c128_i32_10 = arith.constant 128 : i32
      %21 = arith.muli %arg1, %c128_i32_10 : i32
      %22 = tpu.assume_multiple %21, 128 : i32
      %23 = arith.index_cast %22 : i32 to index
      %c0_11 = arith.constant 0 : index
      %24 = vector.load %arg10[%23, %c0_11] : memref<128x128xbf16, #tpu.memory_space<vmem>>, vector<128x128xbf16>
      %25 = arith.extf %24 : vector<128x128xbf16> to vector<128x128xf32>
      %c0_12 = arith.constant 0 : index
      %c0_13 = arith.constant 0 : index
      %c0_14 = arith.constant 0 : index
      %26 = vector.load %arg4[%c0_12, %c0_13, %c0_14] : memref<1x128x1xf32, #tpu.memory_space<vmem>>, vector<1x128x1xf32>
      %27 = vector.shape_cast %26 : vector<1x128x1xf32> to vector<128x1xf32>
      %c0_15 = arith.constant 0 : index
      %c0_16 = arith.constant 0 : index
      %c0_17 = arith.constant 0 : index
      %28 = vector.load %arg9[%c0_15, %c0_16, %c0_17] : memref<1x128x128xf32, #tpu.memory_space<vmem>>, vector<1x128x128xf32>
      %29 = vector.shape_cast %28 : vector<1x128x128xf32> to vector<128x128xf32>
      %c0_18 = arith.constant 0 : index
      %c0_19 = arith.constant 0 : index
      %c0_20 = arith.constant 0 : index
      %30 = vector.load %arg5[%c0_18, %c0_19, %c0_20] : memref<1x128x1xf32, #tpu.memory_space<vmem>>, vector<1x128x1xf32>
      %31 = vector.shape_cast %30 : vector<1x128x1xf32> to vector<128x1xf32>
      %32 = vector.broadcast %31 : vector<128x1xf32> to vector<128x128xf32>
      %33 = arith.mulf %32, %25 : vector<128x128xf32>
      %34 = arith.addf %29, %33 : vector<128x128xf32>
      %35 = vector.broadcast %27 : vector<128x1xf32> to vector<128x128xf32>
      %36 = arith.mulf %35, %34 : vector<128x128xf32>
      %c0_21 = arith.constant 0 : index
      %c0_22 = arith.constant 0 : index
      %c0_23 = arith.constant 0 : index
      %37 = vector.load %arg9[%c0_21, %c0_22, %c0_23] : memref<1x128x128xf32, #tpu.memory_space<vmem>>, vector<1x128x128xf32>
      %38 = vector.shape_cast %37 : vector<1x128x128xf32> to vector<128x128xf32>
      %39 = vector.shape_cast %36 : vector<128x128xf32> to vector<1x128x128xf32>
      tpu.vector_store %arg9[%c0_21, %c0_22, %c0_23], %39 {strides = array<i32>} : memref<1x128x128xf32, #tpu.memory_space<vmem>>, vector<1x128x128xf32>,
    } else {
    }
    return
  }
  func.func @transform_0(%arg0: i32, %arg1: i32, %arg2: i32) -> (i32, i32, i32) {
    %c0_i32 = arith.constant 0 : i32
    return %arg0, %arg1, %arg2 : i32, i32, i32
  }
  func.func @transform_1(%arg0: i32, %arg1: i32, %arg2: i32) -> (i32, i32, i32) {
    %c0_i32 = arith.constant 0 : i32
    %c0_i32_0 = arith.constant 0 : i32
    return %arg0, %arg1, %c0_i32 : i32, i32, i32
  }
  func.func @transform_2(%arg0: i32, %arg1: i32, %arg2: i32) -> (i32, i32, i32) {
    %c0_i32 = arith.constant 0 : i32
    %c0_i32_0 = arith.constant 0 : i32
    return %arg0, %arg1, %c0_i32 : i32, i32, i32
  }
  func.func @transform_3(%arg0: i32, %arg1: i32, %arg2: i32) -> (i32, i32, i32) {
    %c0_i32 = arith.constant 0 : i32
    %c0_i32_0 = arith.constant 0 : i32
    return %arg0, %arg2, %c0_i32 : i32, i32, i32
  }
  func.func @transform_4(%arg0: i32, %arg1: i32, %arg2: i32) -> (i32, i32, i32) {
    %c0_i32 = arith.constant 0 : i32
    %c0_i32_0 = arith.constant 0 : i32
    return %arg0, %arg2, %c0_i32 : i32, i32, i32
  }
  func.func @transform_5(%arg0: i32, %arg1: i32, %arg2: i32) -> (i32, i32) {
    %c0_i32 = arith.constant 0 : i32
    %c0_i32_0 = arith.constant 0 : i32
    %c0_i32_1 = arith.constant 0 : i32
    return %c0_i32, %c0_i32_0 : i32, i32
  }
  func.func @transform_6(%arg0: i32, %arg1: i32, %arg2: i32) -> (i32, i32, i32) {
    %c0_i32 = arith.constant 0 : i32
    %c0_i32_0 = arith.constant 0 : i32
    return %arg0, %arg1, %c0_i32 : i32, i32, i32
  }
}

</mosaic_0001>

<bundles_post_ra>
// kernel: graph_convolution_forward.1
= control target key start
LH: loop header
LB: loop body
LE: loop exit
PB: predicated region body
PF: predicated region fallthrough
CT: control target
= control target key end

     0   :  { %s1772_s21 = smov 0   ;;  %s1774_s22 = smov 0   ;;  %s2016_s0 = inlined_call_operand.vmem [shape: s8[2,128,128], index: 0, kind: input, shape index: {}]   ;;  %s2017_s1 = inlined_call_operand.vmem [shape: f32[2,128,1], index: 1, kind: input, shape index: {}]   ;;  %s2018_s2 = inlined_call_operand.vmem [shape: f32[2,128,1], index: 2, kind: input, shape index: {}]   ;;  %s2019_s3 = inlined_call_operand.vmem [shape: f32[2,128,1], index: 3, kind: input, shape index: {}]   ;;  %s2020_s4 = inlined_call_operand.vmem [shape: bf16[2,128,128], index: 4, kind: input, shape index: {}]   ;;  %s2021_s5 = inlined_call_operand.vmem [shape: bf16[128,128], index: 5, kind: input, shape index: {}]   ;;  %s2022_s6 = inlined_call_operand.vmem [shape: f32[2,128,128], index: 6, kind: output, shape index: {}]  }
   0x1   :  { %s1776_s23 = smov 0  }
   0x2 LB: > { %s35_s24 = sadd.s32 1, %s1730_s22  ;;  %p1536_p0 = scmp.ge.s32.totalorder %s1734_s23, 1  ;;  %s1734_s23 = sphi %s1776_s23, %s16_s23   ;;  %s1730_s22 = sphi %s1774_s22, %s2024_s22   ;;  %s1726_s21 = sphi %s1772_s21, %s2023_s21  }
   0x3   : > { %p37_p1 = scmp.ge.s32.totalorder %s35_s24, 2  ;;  %p313_p2 = scmp.lt.s32.totalorder %s1734_s23, 3 }
   0x5   : > { %s2026_s24 = smov (%p37_p1, %s35_s24), 0  ;;  %p314_p3 = pnand %p1536_p0, %p313_p2 }
   0x6   : > { %v1696_v0 = vld [vmem:[%s2021_s5] sm:$0xff] (!%p314_p3)   ;;  %v1697_v1 = vld [vmem:[%s2021_s5 + $0x8] sm:$0xff] (!%p314_p3)   ;;  %v1736_v2 = vmov (!%p314_p3), 0   ;;  %p391_p4 = scmp.lt.s32.totalorder (!%p314_p3), %s1726_s21, 1  ;;  %v1698_v3 = vld [vmem:[%s2021_s5 + $0x10] sm:$0xff] (!%p314_p3)  }
   0x7   : > { %317 = sbr.rel (%p314_p3) target bundleno = 538 (0x21a), region = 44  ;;  %1694 = vset.pattern.permute.xlu0 (!%p314_p3), %v1736_v2  ;;  %1695 = vset.pattern.permute.xlu1 (!%p314_p3), %v1736_v2  ;;  %v1699_v5 = vld [vmem:[%s2021_s5 + $0x18] sm:$0xff] (!%p314_p3)   ;;  %v1700_v10 = vld [vmem:[%s2021_s5 + $0x20] sm:$0xff] (!%p314_p3)   ;;  %v1701_v13 = vld [vmem:[%s2021_s5 + $0x28] sm:$0xff] (!%p314_p3)  }
   0x8   : > { %1605 = vmatprep.subr.bf16.mxu0 (!%p314_p3), %v1696_v0  ;;  %v1702_v16 = vld [vmem:[%s2021_s5 + $0x30] sm:$0xff] (!%p314_p3)   ;;  %v1703_v19 = vld [vmem:[%s2021_s5 + $0x38] sm:$0xff] (!%p314_p3)  }
   0x9   : > { %1606 = vmatpush3.bf16.msra.mxu0 (!%p314_p3), %v1696_v0 }
   0xa   : > { %1607 = vmatprep.subr.bf16.mxu0 (!%p314_p3), %v1697_v1 }
   0xd   : > { %1608 = vmatpush3.bf16.msra.mxu0 (!%p314_p3), %v1697_v1 }
   0xe   : > { %s2028_s21 = smov (!%p391_p4, %s1726_s21), 1  ;;  %1609 = vmatprep.subr.bf16.mxu0 %v1698_v3 }
   0xf   : > { %s1802_s7 = sshll.u32 %s2028_s21, 7  ;;  %s1571_s11 = sshll.u32 %s2028_s21, 6 }
  0x10   : > { %s1808_s10 = scalar_lea.vmem %s2019_s3, %s1802_s7  ;;  %s1820_s16 = scalar_lea.vmem %s2020_s4, %s1571_s11 }
  0x11   : > { %v732_v4 = vld [vmem:[%s1808_s10] sm:$0xff]  ;;  %v734_v6 = vld [vmem:[%s1808_s10 + $0x10] sm:$0xff]  ;;  %v733_v7 = vld [vmem:[%s1808_s10 + $0x8] sm:$0xff]  ;;  %1610 = vmatpush3.bf16.msra.mxu0 %v1698_v3  ;;  %s1854_s8 = scalar_lea.vmem %s2018_s2, %s1802_s7  ;;  %s1881_s11 = scalar_lea.vmem %s2017_s1, %s1802_s7 }
  0x12   : > { %750 = vperm.xlu0 %1694, %v732_v4   ;;  %760 = vperm.xlu1 %1695, %v734_v6   ;;  %v1704_v8 = vld [vmem:[%s1820_s16] sm:$0xff]   ;;  %v735_v9 = vld [vmem:[%s1808_s10 + $0x18] sm:$0xff]  ;;  %v737_v12 = vld [vmem:[%s1808_s10 + $0x28] sm:$0xff]  ;;  %s1567_s12 = sshll.u32 %s2028_s21, 5  ;;  %s1969_s17 = scalar_lea.vmem %s2022_s6, %s1802_s7 }
  0x13   : > { %1621 = vmatprep.mubr.bf16.mxu0 %v1704_v8  ;;  %1611 = vmatprep.subr.bf16.mxu0 %v1699_v5  ;;  %v736_v11 = vld [vmem:[%s1808_s10 + $0x20] sm:$0xff]  ;;  %v738_v14 = vld [vmem:[%s1808_s10 + $0x30] sm:$0xff]  ;;  %v739_v15 = vld [vmem:[%s1808_s10 + $0x38] sm:$0xff]  ;;  %s1903_s15 = scalar_lea.vmem %s2016_s0, %s1567_s12 }
  0x14   : > { %v740_v17 = vld [vmem:[%s1808_s10 + $0x40] sm:$0xff]  ;;  %v741_v18 = vld [vmem:[%s1808_s10 + $0x48] sm:$0xff]  ;;  %v742_v20 = vld [vmem:[%s1808_s10 + $0x50] sm:$0xff] }
  0x15   : > { %1612 = vmatpush3.bf16.msra.mxu0 %v1699_v5  ;;  %v743_v21 = vld [vmem:[%s1808_s10 + $0x58] sm:$0xff]  ;;  %v744_v22 = vld [vmem:[%s1808_s10 + $0x60] sm:$0xff]  ;;  %v1705_v23 = vld [vmem:[%s1820_s16 + $0x8] sm:$0xff]  }
  0x16   : > { %755 = vperm.xlu0 %1694, %v733_v7   ;;  %765 = vperm.xlu1 %1695, %v735_v9   ;;  %v745_v24 = vld [vmem:[%s1808_s10 + $0x68] sm:$0xff]  ;;  %v1706_v25 = vld [vmem:[%s1820_s16 + $0x10] sm:$0xff]   ;;  %v747_v27 = vld [vmem:[%s1808_s10 + $0x78] sm:$0xff] }
  0x17   : > { %1613 = vmatprep.subr.bf16.mxu0 %v1700_v10  ;;  %v746_v26 = vld [vmem:[%s1808_s10 + $0x70] sm:$0xff]  ;;  %v1121_v28 = vld [vmem:[%s1854_s8] sm:$0xff]  ;;  %v1707_v29 = vld [vmem:[%s1820_s16 + $0x18] sm:$0xff]  }
  0x18   : > { %v1122_v30 = vld [vmem:[%s1854_s8 + $0x8] sm:$0xff]  ;;  %v1708_v31 = vld [vmem:[%s1820_s16 + $0x20] sm:$0xff]   ;;  %v1123_v32 = vld [vmem:[%s1854_s8 + $0x10] sm:$0xff] }
  0x19   : > { %1614 = vmatpush3.bf16.msra.mxu0 %v1700_v10  ;;  %v1124_v33 = vld [vmem:[%s1854_s8 + $0x18] sm:$0xff]  ;;  %v1125_v34 = vld [vmem:[%s1854_s8 + $0x20] sm:$0xff]  ;;  %v1709_v35 = vld [vmem:[%s1820_s16 + $0x28] sm:$0xff]  }
  0x1a   : > { %770 = vperm.xlu0 %1694, %v736_v11   ;;  %775 = vperm.xlu1 %1695, %v737_v12   ;;  %v1126_v36 = vld [vmem:[%s1854_s8 + $0x28] sm:$0xff]  ;;  %v1710_v37 = vld [vmem:[%s1820_s16 + $0x30] sm:$0xff]   ;;  %v1128_v39 = vld [vmem:[%s1854_s8 + $0x38] sm:$0xff] }
  0x1b   : > { %1615 = vmatprep.subr.bf16.mxu0 %v1701_v13  ;;  %v1127_v38 = vld [vmem:[%s1854_s8 + $0x30] sm:$0xff]  ;;  %v1129_v40 = vld [vmem:[%s1854_s8 + $0x40] sm:$0xff]  ;;  %v1711_v41 = vld [vmem:[%s1820_s16 + $0x38] sm:$0xff]  }
  0x1c   : > { %v1130_v42 = vld [vmem:[%s1854_s8 + $0x48] sm:$0xff]  ;;  %v1131_v43 = vld [vmem:[%s1854_s8 + $0x50] sm:$0xff]  ;;  %v1132_v44 = vld [vmem:[%s1854_s8 + $0x58] sm:$0xff] }
  0x1d   : > { %1616 = vmatpush3.bf16.msra.mxu0 %v1701_v13  ;;  %v1133_v45 = vld [vmem:[%s1854_s8 + $0x60] sm:$0xff]  ;;  %v1134_v46 = vld [vmem:[%s1854_s8 + $0x68] sm:$0xff]  ;;  %v1135_v47 = vld [vmem:[%s1854_s8 + $0x70] sm:$0xff] }
  0x1e   : > { %780 = vperm.xlu0 %1694, %v738_v14   ;;  %785 = vperm.xlu1 %1695, %v739_v15   ;;  %v1136_v48 = vld [vmem:[%s1854_s8 + $0x78] sm:$0xff]  ;;  %v1089_v49 = vld [vmem:[%s1881_s11] sm:$0xff]  ;;  %v1090_v50 = vld [vmem:[%s1881_s11 + $0x8] sm:$0xff] }
  0x1f   : > { %1617 = vmatprep.subr.bf16.mxu0 %v1702_v16  ;;  %v1091_v51 = vld [vmem:[%s1881_s11 + $0x10] sm:$0xff]  ;;  %v1092_v52 = vld [vmem:[%s1881_s11 + $0x18] sm:$0xff]  ;;  %v1093_v53 = vld [vmem:[%s1881_s11 + $0x20] sm:$0xff] }
  0x20   : > { %v1094_v54 = vld [vmem:[%s1881_s11 + $0x28] sm:$0xff]  ;;  %v1095_v55 = vld [vmem:[%s1881_s11 + $0x30] sm:$0xff]  ;;  %v1096_v56 = vld [vmem:[%s1881_s11 + $0x38] sm:$0xff] }
  0x21   : > { %1618 = vmatpush3.bf16.msra.mxu0 %v1702_v16  ;;  %v1097_v57 = vld [vmem:[%s1881_s11 + $0x40] sm:$0xff]  ;;  %v1098_v58 = vld [vmem:[%s1881_s11 + $0x48] sm:$0xff]  ;;  %v1099_v59 = vld [vmem:[%s1881_s11 + $0x50] sm:$0xff] }
  0x22   : > { %790 = vperm.xlu0 %1694, %v740_v17   ;;  %795 = vperm.xlu1 %1695, %v741_v18   ;;  %v1100_v60 = vld [vmem:[%s1881_s11 + $0x58] sm:$0xff]  ;;  %v1101_v61 = vld [vmem:[%s1881_s11 + $0x60] sm:$0xff]  ;;  %v1102_v62 = vld [vmem:[%s1881_s11 + $0x68] sm:$0xff] }
  0x23   : > { %1619 = vmatprep.subr.bf16.mxu0 %v1703_v19  ;;  %v1103_v63 = vld [vmem:[%s1881_s11 + $0x70] sm:$0xff]  ;;  %v1104_v0 = vld [vmem:[%s1881_s11 + $0x78] sm:$0xff]  ;;  %v1906_v1 = vld [vmem:[%s1903_s15] sm:$0xff] }
  0x24   : > { %v868_v2 = vunpack.c.l.s8.bf16 %v1906_v1 }
  0x25   : > { %1620 = vmatpush3.bf16.msra.mxu0 %v1703_v19 }
  0x26   : > { %800 = vperm.xlu0 %1694, %v742_v20   ;;  %805 = vperm.xlu1 %1695, %v743_v21  }
  0x27   : > { %1653 = vmatprep.mubr.bf16.mxu1 %v868_v2 }
  0x28   : > { %1622 = vmatmul.mubr.bf16.vlgmr.msra.gmra.mrb[0].mxu0 %v1705_v23 }
  0x29   : > { %1625 = vmatprep.mubr.bf16.mxu0 %v1706_v25 }
  0x2a   : > { %810 = vperm.xlu0 %1694, %v744_v22   ;;  %815 = vperm.xlu1 %1695, %v745_v24  }
  0x2e   : > { %820 = vperm.xlu0 %1694, %v746_v26   ;;  %825 = vperm.xlu1 %1695, %v747_v27  }
  0x30   : > { %1626 = vmatmul.mubr.bf16.gmra.mrb[4].mxu0 %v1707_v29 }
  0x31   : > { %1629 = vmatprep.mubr.bf16.mxu0 %v1708_v31 }
  0x32   : > { %1139 = vperm.xlu0 %1694, %v1121_v28   ;;  %1144 = vperm.xlu1 %1695, %v1122_v30  }
  0x36   : > { %1149 = vperm.xlu0 %1694, %v1123_v32   ;;  %1154 = vperm.xlu1 %1695, %v1124_v33  }
  0x38   : > { %1630 = vmatmul.mubr.bf16.gmra.mrb[8].mxu0 %v1709_v35 }
  0x39   : > { %1633 = vmatprep.mubr.bf16.mxu0 %v1710_v37 }
  0x3a   : > { %1159 = vperm.xlu0 %1694, %v1125_v34   ;;  %1164 = vperm.xlu1 %1695, %v1126_v36  }
  0x3e   : > { %1169 = vperm.xlu0 %1694, %v1127_v38   ;;  %1174 = vperm.xlu1 %1695, %v1128_v39  }
  0x40   : > { %1634 = vmatmul.mubr.bf16.gmra.mrb[12].mxu0 %v1711_v41 }
  0x42   : > { %1179 = vperm.xlu0 %1694, %v1129_v40   ;;  %1184 = vperm.xlu1 %1695, %v1130_v42  }
  0x46   : > { %1189 = vperm.xlu0 %1694, %v1131_v43   ;;  %1194 = vperm.xlu1 %1695, %v1132_v44  }
  0x4a   : > { %1199 = vperm.xlu0 %1694, %v1133_v45   ;;  %1204 = vperm.xlu1 %1695, %v1134_v46  }
  0x4e   : > { %1209 = vperm.xlu0 %1694, %v1135_v47   ;;  %1214 = vperm.xlu1 %1695, %v1136_v48  }
  0x52   : > { %1251 = vperm.xlu0 %1694, %v1089_v49   ;;  %1256 = vperm.xlu1 %1695, %v1090_v50  }
  0x56   : > { %1261 = vperm.xlu0 %1694, %v1091_v51   ;;  %1266 = vperm.xlu1 %1695, %v1092_v52  }
  0x5a   : > { %1271 = vperm.xlu0 %1694, %v1093_v53   ;;  %1276 = vperm.xlu1 %1695, %v1094_v54  }
  0x5e   : > { %1281 = vperm.xlu0 %1694, %v1095_v55   ;;  %1286 = vperm.xlu1 %1695, %v1096_v56  }
  0x62   : > { %1291 = vperm.xlu0 %1694, %v1097_v57   ;;  %1296 = vperm.xlu1 %1695, %v1098_v58  }
  0x66   : > { %1301 = vperm.xlu0 %1694, %v1099_v59   ;;  %1306 = vperm.xlu1 %1695, %v1100_v60  }
  0x6a   : > { %1311 = vperm.xlu0 %1694, %v1101_v61   ;;  %1316 = vperm.xlu1 %1695, %v1102_v62  }
  0x6e   : > { %1321 = vperm.xlu0 %1694, %v1103_v63   ;;  %1326 = vperm.xlu1 %1695, %v1104_v0  }
  0x91   : > { %v751_v3 = vpop.permute.xlu0 %750  ;;  %v761_v4 = vpop.permute.xlu1 %760 }
  0x95   : > { %v756_v5 = vpop.permute.xlu0 %755  ;;  %v766_v6 = vpop.permute.xlu1 %765 }
  0x99   : > { %v771_v7 = vpop.permute.xlu0 %770  ;;  %v776_v8 = vpop.permute.xlu1 %775 }
  0x9d   : > { %v781_v17 = vpop.permute.xlu0 %780  ;;  %v786_v20 = vpop.permute.xlu1 %785 }
  0xa1   : > { %v791_v32 = vpop.permute.xlu0 %790  ;;  %v796_v35 = vpop.permute.xlu1 %795 }
  0xa5   : > { %v801_v47 = vpop.permute.xlu0 %800  ;;  %v806_v50 = vpop.permute.xlu1 %805 }
  0xa9   : > { %v811_v2 = vpop.permute.xlu0 %810 }
  0xfb   : > { %v1623_v9 = vpop.f32.mrb[0].mxu0 }
  0xfc   : > { %vm686_vm0 = vcmp.gt.f32.partialorder %v1623_v9, 0.0  ;;  %v702_v10 = vmul.f32 0.01, %v1623_v9  ;;  %v621_v11 = vpop.f32.mrb[1].mxu0 }
  0xfd   : > { %vm684_vm1 = vcmp.gt.f32.partialorder %v621_v11, 0.0  ;;  %v700_v12 = vmul.f32 0.01, %v621_v11  ;;  %v1624_v13 = vpop.f32.mrb[2].mxu0 }
  0xfe   : > { %v718_v14 = vsel %vm686_vm0, %v1623_v9, %v702_v10  ;;  %vm687_vm2 = vcmp.gt.f32.partialorder %v1624_v13, 0.0  ;;  %v703_v15 = vmul.f32 0.01, %v1624_v13  ;;  %v624_v16 = vpop.f32.mrb[3].mxu0 }
  0xff   : > { %v716_v18 = vsel %vm684_vm1, %v621_v11, %v700_v12  ;;  %vm685_vm3 = vcmp.gt.f32.partialorder %v624_v16, 0.0  ;;  %v701_v19 = vmul.f32 0.01, %v624_v16  ;;  %v830_v22 = vmul.f32 %v761_v4, %v718_v14 }
 0x100   : > { %v719_v21 = vsel %vm687_vm2, %v1624_v13, %v703_v15  ;;  %v828_v25 = vmul.f32 %v751_v3, %v716_v18  ;;  %v816_v3 = vpop.permute.xlu1 %815  ;;  %v821_v18 = vpop.permute.xlu0 %820 }
 0x101   : > { %v831_v23 = vmul.f32 %v766_v6, %v719_v21  ;;  %v717_v24 = vsel %vm685_vm3, %v624_v16, %v701_v19 }
 0x102   : > { %v829_v26 = vmul.f32 %v756_v5, %v717_v24 }
 0x103   : > { %v1909_v27 = vpack.c.bf16 %v831_v23, %v830_v22  ;;  %v1627_v28 = vpop.f32.mrb[4].mxu0 }
 0x104   : > { %v1911_v29 = vpack.c.bf16 %v829_v26, %v828_v25  ;;  %vm690_vm4 = vcmp.gt.f32.partialorder %v1627_v28, 0.0  ;;  %v706_v30 = vmul.f32 0.01, %v1627_v28  ;;  %v637_v31 = vpop.f32.mrb[5].mxu0  ;;  %v826_v19 = vpop.permute.xlu1 %825 }
 0x105   : > { %vm688_vm5 = vcmp.gt.f32.partialorder %v637_v31, 0.0  ;;  %v704_v33 = vmul.f32 0.01, %v637_v31  ;;  %v1628_v34 = vpop.f32.mrb[6].mxu0 }
 0x106   : > { %v722_v36 = vsel %vm690_vm4, %v1627_v28, %v706_v30  ;;  %vm691_vm6 = vcmp.gt.f32.partialorder %v1628_v34, 0.0  ;;  %v707_v37 = vmul.f32 0.01, %v1628_v34  ;;  %v640_v38 = vpop.f32.mrb[7].mxu0  ;;  %1637 = vmatprep.subr.bf16.mxu1 %v1911_v29  ;;  %v865_v30 = vld [vmem:[%s1903_s15 + $0x8] sm:$0xff] }
 0x107   : > { %v720_v39 = vsel %vm688_vm5, %v637_v31, %v704_v33  ;;  %vm689_vm7 = vcmp.gt.f32.partialorder %v640_v38, 0.0  ;;  %v705_v40 = vmul.f32 0.01, %v640_v38  ;;  %1638 = vmatpush3.bf16.msra.mxu1 %v1911_v29  ;;  %v834_v42 = vmul.f32 %v781_v17, %v722_v36  ;;  %v866_v33 = vld [vmem:[%s1903_s15 + $0x10] sm:$0xff]  ;;  %v867_v36 = vld [vmem:[%s1903_s15 + $0x18] sm:$0xff] }
 0x108   : > { %v723_v41 = vsel %vm691_vm6, %v1628_v34, %v707_v37  ;;  %1639 = vmatprep.subr.bf16.mxu1 %v1909_v27  ;;  %v832_v45 = vmul.f32 %v771_v7, %v720_v39  ;;  %v869_v31 = vunpack.c.h.s8.bf16 %v1906_v1  ;;  %v871_v34 = vunpack.c.h.s8.bf16 %v865_v30 }
 0x109   : > { %v835_v43 = vmul.f32 %v786_v20, %v723_v41  ;;  %v721_v44 = vsel %vm689_vm7, %v640_v38, %v705_v40  ;;  %v873_v37 = vunpack.c.h.s8.bf16 %v866_v33  ;;  %v874_v38 = vunpack.c.l.s8.bf16 %v867_v36  ;;  %v1140_v40 = vpop.permute.xlu0 %1139  ;;  %v1145_v41 = vpop.permute.xlu1 %1144 }
 0x10a   : > { %v833_v46 = vmul.f32 %v776_v8, %v721_v44  ;;  %v875_v39 = vunpack.c.h.s8.bf16 %v867_v36 }
 0x10b   : > { %v1916_v48 = vpack.c.bf16 %v835_v43, %v834_v42  ;;  %v1631_v49 = vpop.f32.mrb[8].mxu0  ;;  %1640 = vmatpush3.bf16.msra.mxu1 %v1909_v27 }
 0x10c   : > { %v1919_v51 = vpack.c.bf16 %v833_v46, %v832_v45  ;;  %vm694_vm8 = vcmp.gt.f32.partialorder %v1631_v49, 0.0  ;;  %v710_v52 = vmul.f32 0.01, %v1631_v49  ;;  %v653_v53 = vpop.f32.mrb[9].mxu0 }
 0x10d   : > { %vm692_vm9 = vcmp.gt.f32.partialorder %v653_v53, 0.0  ;;  %v708_v54 = vmul.f32 0.01, %v653_v53  ;;  %v1632_v55 = vpop.f32.mrb[10].mxu0  ;;  %v1150_v1 = vpop.permute.xlu0 %1149 }
 0x10e   : > { %v726_v56 = vsel %vm694_vm8, %v1631_v49, %v710_v52  ;;  %vm695_vm10 = vcmp.gt.f32.partialorder %v1632_v55, 0.0  ;;  %v711_v57 = vmul.f32 0.01, %v1632_v55  ;;  %v656_v58 = vpop.f32.mrb[11].mxu0  ;;  %1641 = vmatprep.subr.bf16.mxu1 %v1919_v51  ;;  %v1155_v42 = vpop.permute.xlu1 %1154 }
 0x10f   : > { %v724_v59 = vsel %vm692_vm9, %v653_v53, %v708_v54  ;;  %vm693_vm11 = vcmp.gt.f32.partialorder %v656_v58, 0.0  ;;  %v709_v60 = vmul.f32 0.01, %v656_v58  ;;  %1642 = vmatpush3.bf16.msra.mxu1 %v1919_v51  ;;  %v838_v62 = vmul.f32 %v801_v47, %v726_v56 }
 0x110   : > { %v727_v61 = vsel %vm695_vm10, %v1632_v55, %v711_v57  ;;  %1643 = vmatprep.subr.bf16.mxu1 %v1916_v48  ;;  %v836_v4 = vmul.f32 %v791_v32, %v724_v59  ;;  %v870_v32 = vunpack.c.l.s8.bf16 %v865_v30 }
 0x111   : > { %v839_v63 = vmul.f32 %v806_v50, %v727_v61  ;;  %v725_v0 = vsel %vm693_vm11, %v656_v58, %v709_v60  ;;  %v1160_v43 = vpop.permute.xlu0 %1159  ;;  %v1075_v61 = vunpack.c.l.bf16 %v1909_v27 }
 0x112   : > { %v837_v5 = vmul.f32 %v796_v35, %v725_v0  ;;  %v872_v35 = vunpack.c.l.s8.bf16 %v866_v33  ;;  %v1165_v44 = vpop.permute.xlu1 %1164  ;;  %v1076_v0 = vunpack.c.h.bf16 %v1909_v27 }
 0x113   : > { %v1924_v6 = vpack.c.bf16 %v839_v63, %v838_v62  ;;  %v1635_v7 = vpop.f32.mrb[12].mxu0  ;;  %1644 = vmatpush3.bf16.msra.mxu1 %v1916_v48  ;;  %v1073_v63 = vunpack.c.l.bf16 %v1911_v29 }
 0x114   : > { %v1927_v8 = vpack.c.bf16 %v837_v5, %v836_v4  ;;  %vm698_vm12 = vcmp.gt.f32.partialorder %v1635_v7, 0.0  ;;  %v714_v9 = vmul.f32 0.01, %v1635_v7  ;;  %v669_v10 = vpop.f32.mrb[13].mxu0  ;;  %v1219_v4 = vmul.f32 %v1150_v1, %v1075_v61 }
 0x115   : > { %vm696_vm13 = vcmp.gt.f32.partialorder %v669_v10, 0.0  ;;  %v712_v11 = vmul.f32 0.01, %v669_v10  ;;  %v1636_v12 = vpop.f32.mrb[14].mxu0  ;;  %v1170_v45 = vpop.permute.xlu0 %1169  ;;  %v1083_v1 = vunpack.c.l.bf16 %v1924_v6 }
 0x116   : > { %v730_v13 = vsel %vm698_vm12, %v1635_v7, %v714_v9  ;;  %vm699_vm14 = vcmp.gt.f32.partialorder %v1636_v12, 0.0  ;;  %v715_v14 = vmul.f32 0.01, %v1636_v12  ;;  %v672_v15 = vpop.f32.mrb[15].mxu0  ;;  %1645 = vmatprep.subr.bf16.mxu1 %v1927_v8  ;;  %v1175_v46 = vpop.permute.xlu1 %1174  ;;  %v1217_v7 = vmul.f32 %v1140_v40, %v1073_v63 }
 0x117   : > { %v728_v16 = vsel %vm696_vm13, %v669_v10, %v712_v11  ;;  %vm697_vm15 = vcmp.gt.f32.partialorder %v672_v15, 0.0  ;;  %v713_v17 = vmul.f32 0.01, %v672_v15  ;;  %1646 = vmatpush3.bf16.msra.mxu1 %v1927_v8  ;;  %v842_v21 = vmul.f32 %v821_v18, %v730_v13 }
 0x118   : > { %v731_v20 = vsel %vm699_vm14, %v1636_v12, %v715_v14  ;;  %1647 = vmatprep.subr.bf16.mxu1 %v1924_v6  ;;  %v840_v24 = vmul.f32 %v811_v2, %v728_v16  ;;  %v1220_v11 = vmul.f32 %v1155_v42, %v1076_v0 }
 0x119   : > { %v843_v22 = vmul.f32 %v826_v19, %v731_v20  ;;  %v729_v23 = vsel %vm697_vm15, %v672_v15, %v713_v17  ;;  %v1945_v47 = vpop.permute.xlu0 %1179  ;;  %v1079_v17 = vunpack.c.l.bf16 %v1916_v48 }
 0x11a   : > { %v841_v25 = vmul.f32 %v816_v3, %v729_v23  ;;  %v1947_v49 = vpop.permute.xlu1 %1184  ;;  %v1074_v3 = vunpack.c.h.bf16 %v1911_v29  ;;  %v1080_v23 = vunpack.c.h.bf16 %v1916_v48 }
 0x11b   : > { %v1932_v26 = vpack.c.bf16 %v843_v22, %v842_v21  ;;  %1648 = vmatpush3.bf16.msra.mxu1 %v1924_v6  ;;  %v1077_v21 = vunpack.c.l.bf16 %v1919_v51  ;;  %v1223_v30 = vmul.f32 %v1170_v45, %v1079_v17 }
 0x11c   : > { %v1935_v28 = vpack.c.bf16 %v841_v25, %v840_v24  ;;  %v1218_v27 = vmul.f32 %v1145_v41, %v1074_v3  ;;  %v1078_v25 = vunpack.c.h.bf16 %v1919_v51  ;;  %v1224_v36 = vmul.f32 %v1175_v46, %v1080_v23 }
 0x11d   : > { %v1949_v50 = vpop.permute.xlu0 %1189  ;;  %v1221_v33 = vmul.f32 %v1160_v43, %v1077_v21  ;;  %v1084_v46 = vunpack.c.h.bf16 %v1924_v6 }
 0x11e   : > { %1649 = vmatprep.subr.bf16.mxu1 %v1935_v28  ;;  %v1951_v52 = vpop.permute.xlu1 %1194  ;;  %v1222_v48 = vmul.f32 %v1165_v44, %v1078_v25  ;;  %v1227_v44 = vmul.f32 %v1949_v50, %v1083_v1 }
 0x11f   : > { %1650 = vmatpush3.bf16.msra.mxu1 %v1935_v28 }
 0x120   : > { %1651 = vmatprep.subr.bf16.mxu1 %v1932_v26 }
 0x121   : > { %v1953_v53 = vpop.permute.xlu0 %1199 }
 0x122   : > { %v1955_v54 = vpop.permute.xlu1 %1204 }
 0x123   : > { %1652 = vmatpush3.bf16.msra.mxu1 %v1932_v26 }
 0x125   : > { %v1957_v55 = vpop.permute.xlu0 %1209 }
 0x126   : > { %1654 = vmatmul.mubr.bf16.vlgmr.msra.gmra.mrb[0].mxu1 %v869_v31  ;;  %v1959_v56 = vpop.permute.xlu1 %1214 }
 0x127   : > { %1657 = vmatprep.mubr.bf16.mxu1 %v870_v32 }
 0x129   : > { %v1252_v57 = vpop.permute.xlu0 %1251 }
 0x12a   : > { %v1257_v58 = vpop.permute.xlu1 %1256 }
 0x12d   : > { %v1262_v59 = vpop.permute.xlu0 %1261 }
 0x12e   : > { %1658 = vmatmul.mubr.bf16.gmra.mrb[4].mxu1 %v871_v34  ;;  %v1267_v60 = vpop.permute.xlu1 %1266 }
 0x12f   : > { %1661 = vmatprep.mubr.bf16.mxu1 %v872_v35 }
 0x131   : > { %v1272_v62 = vpop.permute.xlu0 %1271 }
 0x132   : > { %v1277_v2 = vpop.permute.xlu1 %1276 }
 0x135   : > { %v1282_v12 = vpop.permute.xlu0 %1281 }
 0x136   : > { %1662 = vmatmul.mubr.bf16.gmra.mrb[8].mxu1 %v873_v37  ;;  %v1287_v18 = vpop.permute.xlu1 %1286 }
 0x137   : > { %1665 = vmatprep.mubr.bf16.mxu1 %v874_v38 }
 0x139   : > { %v1292_v31 = vpop.permute.xlu0 %1291 }
 0x13a   : > { %v1297_v37 = vpop.permute.xlu1 %1296 }
 0x13e   : > { %1666 = vmatmul.mubr.bf16.gmra.mrb[12].mxu1 %v875_v39  ;;  %v1307_v61 = vpop.permute.xlu1 %1306 }
 0x1f9   : > { %v1655_v5 = vpop.f32.mrb[0].mxu1 }
 0x1fa   : > { %v1235_v9 = vadd.f32 %v1655_v5, %v1219_v4  ;;  %v922_v10 = vpop.f32.mrb[1].mxu1  ;;  %v1228_v4 = vmul.f32 %v1951_v52, %v1084_v46  ;;  %v1088_v52 = vunpack.c.h.bf16 %v1932_v26 }
 0x1fb   : > { %v1233_v13 = vadd.f32 %v1217_v7, %v922_v10  ;;  %v1656_v14 = vpop.f32.mrb[2].mxu1 }
 0x1fc   : > { %v1331_v15 = vmul.f32 %v1262_v59, %v1235_v9  ;;  %v1236_v29 = vadd.f32 %v1656_v14, %v1220_v11  ;;  %v925_v16 = vpop.f32.mrb[3].mxu1  ;;  %v1087_v9 = vunpack.c.l.bf16 %v1932_v26  ;;  %v1085_v11 = vunpack.c.l.bf16 %v1935_v28  ;;  %v1317_v14 = vpop.permute.xlu1 %1316 }
 0x1fd   : > { %v1329_v19 = vmul.f32 %v1252_v57, %v1233_v13  ;;  %v1234_v20 = vadd.f32 %v1218_v27, %v925_v16  ;;  %v1081_v57 = vunpack.c.l.bf16 %v1927_v8  ;;  %v1086_v27 = vunpack.c.h.bf16 %v1935_v28 }
 0x1fe   : > { %1347 = vst [vmem:[%s1969_s17 + $0x10] sm:$0xff] %v1331_v15  ;;  %v1332_v22 = vmul.f32 %v1267_v60, %v1236_v29  ;;  %v1082_v60 = vunpack.c.h.bf16 %v1927_v8  ;;  %v1231_v15 = vmul.f32 %v1957_v55, %v1087_v9  ;;  %v1229_v16 = vmul.f32 %v1953_v53, %v1085_v11 }
 0x1ff   : > { %1345 = vst [vmem:[%s1969_s17] sm:$0xff] %v1329_v19  ;;  %v1330_v24 = vmul.f32 %v1257_v58, %v1234_v20  ;;  %v1302_v58 = vpop.permute.xlu0 %1301  ;;  %v1232_v19 = vmul.f32 %v1959_v56, %v1088_v52  ;;  %v1230_v21 = vmul.f32 %v1955_v54, %v1086_v27 }
 0x200   : > { %1348 = vst [vmem:[%s1969_s17 + $0x18] sm:$0xff] %v1332_v22 }
 0x201   : > { %1346 = vst [vmem:[%s1969_s17 + $0x8] sm:$0xff] %v1330_v24  ;;  %v1659_v32 = vpop.f32.mrb[4].mxu1  ;;  %v1327_v24 = vpop.permute.xlu1 %1326 }
 0x202   : > { %v1239_v34 = vadd.f32 %v1659_v32, %v1223_v30  ;;  %v938_v35 = vpop.f32.mrb[5].mxu1 }
 0x203   : > { %v1237_v38 = vadd.f32 %v1221_v33, %v938_v35  ;;  %v1660_v39 = vpop.f32.mrb[6].mxu1  ;;  %v1312_v10 = vpop.permute.xlu0 %1311 }
 0x204   : > { %v1335_v40 = vmul.f32 %v1282_v12, %v1239_v34  ;;  %v1240_v41 = vadd.f32 %v1660_v39, %v1224_v36  ;;  %v941_v51 = vpop.f32.mrb[7].mxu1 }
 0x205   : > { %v1333_v42 = vmul.f32 %v1272_v62, %v1237_v38  ;;  %v1238_v45 = vadd.f32 %v1222_v48, %v941_v51  ;;  %v1225_v62 = vmul.f32 %v1945_v47, %v1081_v57 }
 0x206   : > { %1351 = vst [vmem:[%s1969_s17 + $0x30] sm:$0xff] %v1335_v40  ;;  %v1336_v43 = vmul.f32 %v1287_v18, %v1240_v41 }
 0x207   : > { %1349 = vst [vmem:[%s1969_s17 + $0x20] sm:$0xff] %v1333_v42  ;;  %v1334_v59 = vmul.f32 %v1277_v2, %v1238_v45  ;;  %v1226_v2 = vmul.f32 %v1947_v49, %v1082_v60  ;;  %v1322_v26 = vpop.permute.xlu0 %1321 }
 0x208   : > { %1352 = vst [vmem:[%s1969_s17 + $0x38] sm:$0xff] %v1336_v43 }
 0x209   : > { %1350 = vst [vmem:[%s1969_s17 + $0x28] sm:$0xff] %v1334_v59  ;;  %v1663_v63 = vpop.f32.mrb[8].mxu1 }
 0x20a   : > { %v1243_v0 = vadd.f32 %v1663_v63, %v1227_v44  ;;  %v954_v3 = vpop.f32.mrb[9].mxu1 }
 0x20b   : > { %v1241_v5 = vadd.f32 %v1225_v62, %v954_v3  ;;  %v1664_v6 = vpop.f32.mrb[10].mxu1 }
 0x20c   : > { %v1339_v8 = vmul.f32 %v1302_v58, %v1243_v0  ;;  %v1244_v7 = vadd.f32 %v1664_v6, %v1228_v4  ;;  %v957_v50 = vpop.f32.mrb[11].mxu1 }
 0x20d   : > { %v1337_v47 = vmul.f32 %v1292_v31, %v1241_v5  ;;  %v1242_v12 = vadd.f32 %v1226_v2, %v957_v50 }
 0x20e   : > { %1355 = vst [vmem:[%s1969_s17 + $0x50] sm:$0xff] %v1339_v8  ;;  %v1340_v13 = vmul.f32 %v1307_v61, %v1244_v7 }
 0x20f   : > { %1353 = vst [vmem:[%s1969_s17 + $0x40] sm:$0xff] %v1337_v47  ;;  %v1338_v49 = vmul.f32 %v1297_v37, %v1242_v12 }
 0x210   : > { %1356 = vst [vmem:[%s1969_s17 + $0x58] sm:$0xff] %v1340_v13 }
 0x211   : > { %1354 = vst [vmem:[%s1969_s17 + $0x48] sm:$0xff] %v1338_v49  ;;  %v1667_v29 = vpop.f32.mrb[12].mxu1 }
 0x212   : > { %v1247_v17 = vadd.f32 %v1667_v29, %v1231_v15  ;;  %v970_v18 = vpop.f32.mrb[13].mxu1 }
 0x213   : > { %v1245_v20 = vadd.f32 %v1229_v16, %v970_v18  ;;  %v1668_v28 = vpop.f32.mrb[14].mxu1 }
 0x214   : > { %v1343_v22 = vmul.f32 %v1322_v26, %v1247_v17  ;;  %v1248_v23 = vadd.f32 %v1668_v28, %v1232_v19  ;;  %v973_v55 = vpop.f32.mrb[15].mxu1 }
 0x215   : > { %v1341_v25 = vmul.f32 %v1312_v10, %v1245_v20  ;;  %v1246_v30 = vadd.f32 %v1230_v21, %v973_v55 }
 0x216   : > { %1359 = vst [vmem:[%s1969_s17 + $0x70] sm:$0xff] %v1343_v22  ;;  %v1344_v53 = vmul.f32 %v1327_v24, %v1248_v23 }
 0x217   : > { %1357 = vst [vmem:[%s1969_s17 + $0x60] sm:$0xff] %v1341_v25  ;;  %v1342_v31 = vmul.f32 %v1317_v14, %v1246_v30 }
 0x218   : > { %1360 = vst [vmem:[%s1969_s17 + $0x78] sm:$0xff] %v1344_v53 }
 0x219   : > { %1358 = vst [vmem:[%s1969_s17 + $0x68] sm:$0xff] %v1342_v31 }
 0x21a PF: > { %s16_s23 = sadd.s32 1, %s1734_s23   ;;  %s2023_s21 = smov %s1730_s22 }
 0x21b   : > { %p13_p5 = scmp.ge.s32.totalorder %s16_s23, 4   ;;  %s2024_s22 = smov %s2026_s24 }
 0x21d   :  { %15 = sbr.rel (!%p13_p5) target bundleno = 2 (0x2), region = 105 }

</bundles_post_ra>
